<compile_context>
chip_gen: v7x
topology: tpu7x:2x2x1
jax: 0.10.0
libtpu: 0.0.40
codegen_flags: <defaults>
</compile_context>

<pallas_src>
import jax
import jax.numpy as jnp
from jax.experimental import pallas as pl
from jax.experimental.pallas import tpu as pltpu

OUT_OF_RANGE_PENALTY = 2.0  # module constant from __init__ (no learned weights)

_THRESHOLD = 222.5
_SCALE = 20.0
_TILE_BYTES = 4 * 1024 * 1024      # ~4 MiB input tiles (double-buffered -> ~8 MiB VMEM)
_VMEM_LIMIT = 32 * 1024 * 1024     # explicit scoped-VMEM limit (raises v5e's 16 MiB default)


def _num_splits():
    """2 on multi-TensorCore chips (v7x), else 1 (v5e / v6e are single-TC)."""
    try:
        kind = jax.devices()[0].device_kind.lower()
    except Exception:
        return 1
    return 2 if ("v7" in kind or "7x" in kind) else 1


def _make_kernel(n_rows_valid, tile_rows, steps_per_split, lanes):
    groups = tile_rows // 8  # tile_rows is always a multiple of 8

    def kernel(x_ref, o_ref):
        c = pl.program_id(0)
        k = pl.program_id(1)

        @pl.when(k == 0)
        def _init():
            # Accumulator is the (8, lanes) output block itself -> trivial init.
            o_ref[...] = jnp.zeros_like(o_ref)

        # Number of real rows in this step: >= tile_rows for full tiles,
        # in (0, tile_rows) for the ragged final block, <= 0 for redundant
        # steps introduced by the split rounding (those are skipped entirely).
        rows_rem = n_rows_valid - (c * steps_per_split + k) * tile_rows

        def _accumulate(row_bound):
            x = x_ref[...].astype(jnp.float32)            # cast in-kernel (free VPU op)
            t = jnp.tanh((x - _THRESHOLD) * _SCALE) + 1.0
            if row_bound is not None:
                row = jax.lax.broadcasted_iota(jnp.int32, (tile_rows, lanes), 0)
                t = jnp.where(row < row_bound, t, 0.0)
            # Fold groups of 8 sublane-rows into the small (8, lanes) accumulator.
            o_ref[...] += jnp.sum(t.reshape(groups, 8, lanes), axis=0)

        @pl.when(rows_rem >= tile_rows)       # hot path: full tile, no row mask
        def _full():
            _accumulate(None)

        @pl.when(jnp.logical_and(rows_rem > 0, rows_rem < tile_rows))
        def _ragged():                        # boundary tile: mask garbage/OOB rows
            _accumulate(rows_rem)

    return kernel


def _launch(slab, n_rows_valid):
    """Reduce a (rows_phys, lanes) slab row-wise -> (n_split*8, lanes) partial sums."""
    rows_phys, lanes = slab.shape
    itemsize = jnp.dtype(slab.dtype).itemsize

    budget_rows = max(8, (_TILE_BYTES // (lanes * itemsize)) // 8 * 8)
    # Never let a block exceed the physical row count (floor to a multiple of 8);
    # the ragged remainder is handled by the in-kernel row mask.
    tile_rows = min(budget_rows, max(8, (n_rows_valid // 8) * 8))
    row_blocks = -(-n_rows_valid // tile_rows)

    n_split = min(_num_splits(), row_blocks)
    steps_per_split = -(-row_blocks // n_split)

    def x_index_map(c, k):
        blk = c * steps_per_split + k
        # Clamp the (at most n_split-1) redundant trailing steps onto the last
        # real block; their contribution is zeroed in-kernel (rows_rem <= 0).
        return (jnp.minimum(blk, row_blocks - 1), 0)

    kernel = _make_kernel(n_rows_valid, tile_rows, steps_per_split, lanes)

    total = rows_phys * lanes
    cost = pl.CostEstimate(
        flops=6 * total,
        transcendentals=total,
        bytes_accessed=total * itemsize + n_split * 8 * lanes * 4,
    )

    return pl.pallas_call(
        kernel,
        out_shape=jax.ShapeDtypeStruct((n_split * 8, lanes), jnp.float32),
        grid_spec=pltpu.PrefetchScalarGridSpec(
            num_scalar_prefetch=0,
            grid=(n_split, steps_per_split),
            in_specs=[pl.BlockSpec((tile_rows, lanes), x_index_map)],
            out_specs=pl.BlockSpec((8, lanes), lambda c, k: (c, 0)),
        ),
        compiler_params=pltpu.CompilerParams(
            dimension_semantics=("parallel", "arbitrary"),
            vmem_limit_bytes=_VMEM_LIMIT,
        ),
        cost_estimate=cost,
    )(slab)


@jax.jit
def range_loss(y_pred, y=None):
    """Pallas implementation of RangeLoss.forward (y is unused, as in PyTorch)."""
    del y  # target tensor is not used by the reference forward pass

    shape = y_pred.shape
    B = shape[0]
    C = shape[-1]
    n_ids = 1
    for d in shape[:-1]:
        n_ids *= d

    use_fused_channel_select = (C <= 4) and (n_ids % 128 == 0) and (n_ids // 128 >= 8)

    if use_fused_channel_select:
        # Free (bitcast) reshape of the FULL y_pred into a lane-dense slab whose
        # width is a multiple of both 128 and C: channel identity depends only on
        # the lane index, so selection happens on the tiny per-lane partial sums
        # below.  The kernel reads y_pred exactly once; no slice/cast/pad copy.
        lanes = 128 * C
        n_rows_valid = n_ids // 128
        slab = y_pred.reshape(n_rows_valid, lanes)
        channel_period = C
    else:
        # Fallback for large C or awkward element counts: slice channel 0 in the
        # wrapper and pad up to a (>=8, 128) slab (this re-materializes pred_ids
        # in HBM, which is exactly what the fused path above avoids).
        # TODO(synk): the <=127 zero-pad elements inside the last valid row still
        # rely on tanh(-4450) ~= -1 (contribution ~0); exact lane masking of that
        # single partial row is skipped in this fallback path.
        pred_flat = y_pred[..., 0].reshape(-1)
        lanes = 128
        n_rows_valid = -(-n_ids // lanes)
        rows_phys = max(n_rows_valid, 8)
        pred_flat = jnp.pad(pred_flat, (0, rows_phys * lanes - n_ids))
        slab = pred_flat.reshape(rows_phys, lanes)
        channel_period = 1

    out = _launch(slab, n_rows_valid)                       # (n_split*8, lanes)

    lane_mask = (jnp.arange(lanes, dtype=jnp.int32) % channel_period) == 0
    per_lane = jnp.sum(out.reshape(-1, lanes), axis=0)      # tiny reduction
    total = jnp.sum(jnp.where(lane_mask, per_lane, 0.0))    # sum over channel-0 lanes

    # sum(tanh + 1) over channel 0  ->  * 0.5 * penalty / batch.
    return total * (0.5 * OUT_OF_RANGE_PENALTY / B)


if __name__ == "__main__":
    key = jax.random.PRNGKey(0)
    k1, k2, k3 = jax.random.split(key, 3)

    def reference(yp):
        pred_ids = yp[..., 0]
        oor = (jnp.tanh(20.0 * (pred_ids - 222.5)) + 1.0) / 2.0
        return jnp.mean(jnp.sum(oor, axis=(1, 2, 3))) * OUT_OF_RANGE_PENALTY

    # Primary test: shapes hit the fused in-kernel channel-select path.
    B, D1, D2, D3, C = 2, 4, 8, 16, 3
    # Center values near the 222.5 threshold so tanh is not trivially saturated.
    y_pred = _THRESHOLD + 2.0 * jax.random.normal(k1, (B, D1, D2, D3, C), dtype=jnp.float32)
    y_true = jax.random.normal(k2, (B, D1, D2, D3, C), dtype=jnp.float32)  # unused

    loss = jax.block_until_ready(range_loss(y_pred, y_true))
    ref = reference(y_pred)
    assert jnp.allclose(loss, ref, rtol=1e-5, atol=1e-3), (loss, ref)

    # Secondary test: awkward sizes exercise the padded fallback path.
    y_pred2 = _THRESHOLD + 2.0 * jax.random.normal(k3, (2, 3, 5, 7, 3), dtype=jnp.float32)
    loss2 = jax.block_until_ready(range_loss(y_pred2, None))
    ref2 = reference(y_pred2)
    assert jnp.allclose(loss2, ref2, rtol=1e-5, atol=1e-3), (loss2, ref2)

    print("KERNEL_OK")
</pallas_src>

<mosaic_0001>
module attributes {stable_mosaic.version = 11 : i64} {
  func.func @kernel(%arg0: i32, %arg1: i32, %arg2: memref<8x384xf32, #tpu.memory_space<vmem>>, %arg3: memref<8x384xf32, #tpu.memory_space<vmem>>) attributes {dimension_semantics = [#tpu.dimension_semantics<parallel>, #tpu.dimension_semantics<arbitrary>], iteration_bounds = array<i64: 1, 1>, scalar_prefetch = 0 : i64, scratch_operands = 0 : i64, tpu.core_type = #tpu.core_type<tc>, window_params = [{transform_indices = @transform_0, window_bounds = array<i64: 8, 384>}, {transform_indices = @transform_1, window_bounds = array<i64: 8, 384>}]} {
    %c0_i32 = arith.constant 0 : i32
    %0 = arith.cmpi eq, %arg1, %c0_i32 : i32
    %1 = arith.extui %0 : i1 to i32
    %c0_i32_0 = arith.constant 0 : i32
    %2 = arith.cmpi ne, %1, %c0_i32_0 : i32
    scf.if %2 {
      %cst = arith.constant 0.000000e+00 : f32
      %15 = vector.broadcast %cst : f32 to vector<8x384xf32>
      %c0 = arith.constant 0 : index
      %c0_7 = arith.constant 0 : index
      %16 = vector.load %arg3[%c0, %c0_7] : memref<8x384xf32, #tpu.memory_space<vmem>>, vector<8x384xf32>
      tpu.vector_store %arg3[%c0, %c0_7], %15 {strides = array<i32>} : memref<8x384xf32, #tpu.memory_space<vmem>>, vector<8x384xf32>,
    } else {
    }
    %c1_i32 = arith.constant 1 : i32
    %3 = arith.muli %arg0, %c1_i32 : i32
    %4 = arith.addi %3, %arg1 : i32
    %c8_i32 = arith.constant 8 : i32
    %5 = arith.muli %4, %c8_i32 : i32
    %c8_i32_1 = arith.constant 8 : i32
    %6 = arith.subi %c8_i32_1, %5 : i32
    %c8_i32_2 = arith.constant 8 : i32
    %7 = arith.cmpi sge, %6, %c8_i32_2 : i32
    %8 = arith.extui %7 : i1 to i32
    %c0_i32_3 = arith.constant 0 : i32
    %9 = arith.cmpi ne, %8, %c0_i32_3 : i32
    scf.if %9 {
      %c0 = arith.constant 0 : index
      %c0_7 = arith.constant 0 : index
      %15 = vector.load %arg2[%c0, %c0_7] : memref<8x384xf32, #tpu.memory_space<vmem>>, vector<8x384xf32>
      %cst = arith.constant 2.225000e+02 : f32
      %16 = vector.broadcast %cst : f32 to vector<8x384xf32>
      %17 = arith.subf %15, %16 : vector<8x384xf32>
      %cst_8 = arith.constant 2.000000e+01 : f32
      %18 = vector.broadcast %cst_8 : f32 to vector<8x384xf32>
      %19 = arith.mulf %17, %18 : vector<8x384xf32>
      %20 = math.tanh %19 : vector<8x384xf32>
      %cst_9 = arith.constant 1.000000e+00 : f32
      %21 = vector.broadcast %cst_9 : f32 to vector<8x384xf32>
      %22 = arith.addf %20, %21 : vector<8x384xf32>
      %c0_10 = arith.constant 0 : index
      %c0_11 = arith.constant 0 : index
      %23 = vector.load %arg3[%c0_10, %c0_11] : memref<8x384xf32, #tpu.memory_space<vmem>>, vector<8x384xf32>
      %24 = vector.shape_cast %22 : vector<8x384xf32> to vector<1x8x384xf32>
      %cst_12 = arith.constant dense<0.000000e+00> : vector<8x384xf32>
      %25 = vector.multi_reduction <add>, %24, %cst_12 [0] : vector<1x8x384xf32> to vector<8x384xf32>
      %26 = arith.addf %23, %25 : vector<8x384xf32>
      %c0_13 = arith.constant 0 : index
      %c0_14 = arith.constant 0 : index
      %27 = vector.load %arg3[%c0_13, %c0_14] : memref<8x384xf32, #tpu.memory_space<vmem>>, vector<8x384xf32>
      tpu.vector_store %arg3[%c0_13, %c0_14], %26 {strides = array<i32>} : memref<8x384xf32, #tpu.memory_space<vmem>>, vector<8x384xf32>,
    } else {
    }
    %c0_i32_4 = arith.constant 0 : i32
    %10 = arith.cmpi sgt, %6, %c0_i32_4 : i32
    %c8_i32_5 = arith.constant 8 : i32
    %11 = arith.cmpi slt, %6, %c8_i32_5 : i32
    %12 = arith.andi %10, %11 : i1
    %13 = arith.extui %12 : i1 to i32
    %c0_i32_6 = arith.constant 0 : i32
    %14 = arith.cmpi ne, %13, %c0_i32_6 : i32
    scf.if %14 {
      %c0 = arith.constant 0 : index
      %c0_7 = arith.constant 0 : index
      %15 = vector.load %arg2[%c0, %c0_7] : memref<8x384xf32, #tpu.memory_space<vmem>>, vector<8x384xf32>
      %cst = arith.constant 2.225000e+02 : f32
      %16 = vector.broadcast %cst : f32 to vector<8x384xf32>
      %17 = arith.subf %15, %16 : vector<8x384xf32>
      %cst_8 = arith.constant 2.000000e+01 : f32
      %18 = vector.broadcast %cst_8 : f32 to vector<8x384xf32>
      %19 = arith.mulf %17, %18 : vector<8x384xf32>
      %20 = math.tanh %19 : vector<8x384xf32>
      %cst_9 = arith.constant 1.000000e+00 : f32
      %21 = vector.broadcast %cst_9 : f32 to vector<8x384xf32>
      %22 = arith.addf %20, %21 : vector<8x384xf32>
      %23 = tpu.iota {dimensions = array<i32: 0>} : vector<8x384xi32>
      %24 = vector.broadcast %6 : i32 to vector<8x384xi32>
      %25 = arith.cmpi slt, %23, %24 : vector<8x384xi32>
      %cst_10 = arith.constant 0.000000e+00 : f32
      %26 = vector.broadcast %cst_10 : f32 to vector<8x384xf32>
      %27 = arith.select %25, %22, %26 : vector<8x384xi1>, vector<8x384xf32>
      %c0_11 = arith.constant 0 : index
      %c0_12 = arith.constant 0 : index
      %28 = vector.load %arg3[%c0_11, %c0_12] : memref<8x384xf32, #tpu.memory_space<vmem>>, vector<8x384xf32>
      %29 = vector.shape_cast %27 : vector<8x384xf32> to vector<1x8x384xf32>
      %cst_13 = arith.constant dense<0.000000e+00> : vector<8x384xf32>
      %30 = vector.multi_reduction <add>, %29, %cst_13 [0] : vector<1x8x384xf32> to vector<8x384xf32>
      %31 = arith.addf %28, %30 : vector<8x384xf32>
      %c0_14 = arith.constant 0 : index
      %c0_15 = arith.constant 0 : index
      %32 = vector.load %arg3[%c0_14, %c0_15] : memref<8x384xf32, #tpu.memory_space<vmem>>, vector<8x384xf32>
      tpu.vector_store %arg3[%c0_14, %c0_15], %31 {strides = array<i32>} : memref<8x384xf32, #tpu.memory_space<vmem>>, vector<8x384xf32>,
    } else {
    }
    return
  }
  func.func @transform_0(%arg0: i32, %arg1: i32) -> (i32, i32) {
    %c1_i32 = arith.constant 1 : i32
    %0 = arith.muli %arg0, %c1_i32 : i32
    %1 = arith.addi %0, %arg1 : i32
    %c0_i32 = arith.constant 0 : i32
    %2 = arith.minsi %1, %c0_i32 : i32
    %c0_i32_0 = arith.constant 0 : i32
    %c0_i32_1 = arith.constant 0 : i32
    return %2, %c0_i32_0 : i32, i32
  }
  func.func @transform_1(%arg0: i32, %arg1: i32) -> (i32, i32) {
    %c0_i32 = arith.constant 0 : i32
    %c0_i32_0 = arith.constant 0 : i32
    return %arg0, %c0_i32 : i32, i32
  }
}

</mosaic_0001>

<bundles_post_ra>
// kernel: range_loss.1
= control target key start
LH: loop header
LB: loop body
LE: loop exit
PB: predicated region body
PF: predicated region fallthrough
CT: control target
= control target key end

     0   :  { %s170_s0 = inlined_call_operand.vmem [shape: f32[8,384], index: 0, kind: input, shape index: {}]   ;;  %s171_s1 = inlined_call_operand.vmem [shape: f32[8,384], index: 1, kind: output, shape index: {}]  }
   0x1   :  { %v52_v0 = vld [vmem:[%s170_s0] sm:$0xff]  ;;  %v53_v1 = vld [vmem:[%s170_s0 + $0x8] sm:$0xff]  ;;  %v54_v2 = vld [vmem:[%s170_s0 + $0x10] sm:$0xff] }
   0x2   :  { %v129_v3 = vadd.f32 -222.5, %v52_v0  ;;  %v130_v4 = vadd.f32 -222.5, %v53_v1  ;;  %v131_v5 = vadd.f32 -222.5, %v54_v2 }
   0x4   :  { %v58_v6 = vmul.f32 20.0, %v129_v3  ;;  %v59_v7 = vmul.f32 20.0, %v130_v4  ;;  %v60_v8 = vmul.f32 20.0, %v131_v5 }
   0x6   :  { %136 = vtanh.f32 %v58_v6 }
   0x7   :  { %138 = vtanh.f32 %v59_v7 }
   0x8   :  { %140 = vtanh.f32 %v60_v8 }
  0x10   :  { %v137_v9 = vpop.eup %136 }
  0x11   :  { %v139_v10 = vpop.eup %138  ;;  %v64_v11 = vadd.f32 1.0, %v137_v9 }
  0x12   :  { %v141_v12 = vpop.eup %140  ;;  %v65_v13 = vadd.f32 1.0, %v139_v10 }
  0x13   :  { %v66_v14 = vadd.f32 1.0, %v141_v12  ;;  %76 = vst [vmem:[%s171_s1] sm:$0xff] %v64_v11 }
  0x14   :  { %77 = vst [vmem:[%s171_s1 + $0x8] sm:$0xff] %v65_v13 }
  0x15   :  { %78 = vst [vmem:[%s171_s1 + $0x10] sm:$0xff] %v66_v14 }

</bundles_post_ra>
